<compile_context>
chip_gen: v5e
topology: v5e:2x2
jax: 0.10.0
libtpu: 0.0.40
codegen_flags: <defaults>
</compile_context>

<pallas_src>
import functools

import jax
import jax.numpy as jnp
from jax.experimental import pallas as pl
from jax.experimental.pallas import tpu as pltpu

_LANE = 128


def _round_up(x, m):
    return (x + m - 1) // m * m


# ---------------------------------------------------------------------------
# Kernel 1: per-node projections  xl = x @ Wl + bl,  xr = x @ Wr + br
# ---------------------------------------------------------------------------
def _proj_kernel(x_ref, wl_ref, wr_ref, bl_ref, br_ref, xl_ref, xr_ref):
    xb = x_ref[...].astype(jnp.bfloat16)
    xl_ref[...] = (jnp.dot(xb, wl_ref[...].astype(jnp.bfloat16),
                           preferred_element_type=jnp.float32)
                   + bl_ref[...])
    xr_ref[...] = (jnp.dot(xb, wr_ref[...].astype(jnp.bfloat16),
                           preferred_element_type=jnp.float32)
                   + br_ref[...])


def gatv2_project(x_pad, wl, wr, bl, br, *, tile_i=128):
    n_pad, f = x_pad.shape
    c_pad = wl.shape[1]
    assert n_pad % tile_i == 0 and c_pad % _LANE == 0
    return pl.pallas_call(
        _proj_kernel,
        out_shape=(jax.ShapeDtypeStruct((n_pad, c_pad), jnp.float32),
                   jax.ShapeDtypeStruct((n_pad, c_pad), jnp.float32)),
        grid_spec=pltpu.PrefetchScalarGridSpec(
            num_scalar_prefetch=0,
            grid=(n_pad // tile_i,),
            in_specs=[
                pl.BlockSpec((tile_i, f), lambda i: (i, 0)),   # x row tile
                pl.BlockSpec((f, c_pad), lambda i: (0, 0)),    # Wl
                pl.BlockSpec((f, c_pad), lambda i: (0, 0)),    # Wr
                pl.BlockSpec((1, c_pad), lambda i: (0, 0)),    # bl
                pl.BlockSpec((1, c_pad), lambda i: (0, 0)),    # br
            ],
            out_specs=[pl.BlockSpec((tile_i, c_pad), lambda i: (i, 0)),
                       pl.BlockSpec((tile_i, c_pad), lambda i: (i, 0))]),
        compiler_params=pltpu.CompilerParams(
            dimension_semantics=("parallel",),
            vmem_limit_bytes=32 * 1024 * 1024),
    )(x_pad, wl, wr, bl, br)


# ---------------------------------------------------------------------------
# Kernel 2: masked-softmax attention + aggregation (flash style, heads=1)
# ---------------------------------------------------------------------------
def _gatv2_attn_kernel(nnz_ref, xr_ref, xl_ref, att_ref, bias_ref, adj_ref,
                       out_ref, m_s, l_s, acc_s, *, apply_elu, row_chunk):
    """One (target tile i, source tile j) step of a GATv2 layer (heads=1).

    GATv2 semantics (PyG defaults, share_weights=False, negative_slope=0.2):
      e[i, j]    = att . leaky_relu(xr[i] + xl[j])   for edge j -> i
      alpha[i,:] = softmax_j over edges into i (masked by adj)
      out[i]     = sum_j alpha[i, j] * xl[j] + bias
    Softmax over j is computed online (flash style) across source tiles.
    """
    i = pl.program_id(0)
    j = pl.program_id(1)
    nj = pl.num_programs(1)

    @pl.when(j == 0)
    def _init():
        m_s[...] = jnp.full_like(m_s, -jnp.inf)
        l_s[...] = jnp.zeros_like(l_s)
        acc_s[...] = jnp.zeros_like(acc_s)

    # Skip tiles with no edges entirely (scalar-prefetched per-tile counts).
    @pl.when(nnz_ref[i, j] > 0)
    def _update():
        xr = xr_ref[...]                               # [TI, C] f32
        xl = xl_ref[...]                               # [TJ, C] f32
        att = att_ref[...]                             # [1,  C] f32
        ti = xr.shape[0]

        # Score block s[a, b] = att . leaky_relu(xr[a] + xl[b]); built in
        # target-row chunks so the 3-D broadcast temp stays small while the
        # channel axis remains fully lane-dense (C multiple of 128).
        parts = []
        for r0 in range(0, ti, row_chunk):
            z = xr[r0:r0 + row_chunk, :][:, None, :] + xl[None, :, :]
            z = jnp.where(z > 0, z, 0.2 * z)           # leaky_relu(0.2)
            parts.append(jnp.sum(z * att[None, :, :], axis=-1))
        s = jnp.concatenate(parts, axis=0)             # [TI, TJ]

        # int8 adjacency mask (target-major); exp(-1e30 - m) underflows to 0,
        # so no second mask on p is needed.
        s = jnp.where(adj_ref[...] != 0, s, -1e30)

        # Online softmax across source tiles.
        m_prev = m_s[...]
        m_new = jnp.maximum(m_prev, jnp.max(s, axis=-1, keepdims=True))
        corr = jnp.exp(m_prev - m_new)
        p = jnp.exp(s - m_new)
        l_s[...] = corr * l_s[...] + jnp.sum(p, axis=-1, keepdims=True)
        acc_s[...] = corr * acc_s[...] + jnp.dot(
            p.astype(jnp.bfloat16), xl.astype(jnp.bfloat16),
            preferred_element_type=jnp.float32)
        m_s[...] = m_new

    @pl.when(j == nj - 1)
    def _finalize():
        # Deferred normalization on the [TI, C] accumulator (EUP reciprocal).
        inv = pl.reciprocal(jnp.maximum(l_s[...], 1e-20), approx=True)
        out = acc_s[...] * inv + bias_ref[...]
        if apply_elu:
            # exp only on the clamped-negative branch (never overflows).
            out = jnp.where(out > 0, out,
                            jnp.exp(jnp.minimum(out, 0.0)) - 1.0)
        out_ref[...] = out.astype(out_ref.dtype)


def gatv2_attention(xl, xr, adj_pad, tile_nnz, att, bias, *, apply_elu,
                    tile_i=128, tile_j=128, row_chunk=32):
    n_pad, c_pad = xl.shape
    assert n_pad % tile_i == 0 and n_pad % tile_j == 0
    assert c_pad % _LANE == 0
    row_chunk = min(row_chunk, tile_i)
    assert tile_i % row_chunk == 0
    grid = (n_pad // tile_i, n_pad // tile_j)
    kern = functools.partial(_gatv2_attn_kernel, apply_elu=apply_elu,
                             row_chunk=row_chunk)
    return pl.pallas_call(
        kern,
        out_shape=jax.ShapeDtypeStruct((n_pad, c_pad), jnp.float32),
        grid_spec=pltpu.PrefetchScalarGridSpec(
            num_scalar_prefetch=1,                               # tile_nnz
            grid=grid,
            in_specs=[
                pl.BlockSpec((tile_i, c_pad), lambda i, j, nnz: (i, 0)),   # xr
                pl.BlockSpec((tile_j, c_pad), lambda i, j, nnz: (j, 0)),   # xl
                pl.BlockSpec((1, c_pad), lambda i, j, nnz: (0, 0)),        # att
                pl.BlockSpec((1, c_pad), lambda i, j, nnz: (0, 0)),        # bias
                pl.BlockSpec((tile_i, tile_j), lambda i, j, nnz: (i, j)),  # adj
            ],
            out_specs=pl.BlockSpec((tile_i, c_pad), lambda i, j, nnz: (i, 0)),
            scratch_shapes=[
                pltpu.VMEM((tile_i, 1), jnp.float32),      # running max
                pltpu.VMEM((tile_i, 1), jnp.float32),      # running sum
                pltpu.VMEM((tile_i, c_pad), jnp.float32),  # output accumulator
            ]),
        compiler_params=pltpu.CompilerParams(
            dimension_semantics=("parallel", "arbitrary"),
            vmem_limit_bytes=32 * 1024 * 1024),
    )(tile_nnz, xr, xl, att, bias, adj_pad)


def gatv2_layer(x_pad, adj_pad, tile_nnz, p, *, apply_elu, tile=128):
    xl, xr = gatv2_project(x_pad, p["wl"], p["wr"], p["bl"], p["br"],
                           tile_i=tile)
    return gatv2_attention(xl, xr, adj_pad, tile_nnz, p["att"], p["bias"],
                           apply_elu=apply_elu, tile_i=tile, tile_j=tile)


def gat_encoder_forward(params, x, adj, *, out_dim, tile=128):
    """h1 = ELU(GATv2Conv_1(x)); h2 = GATv2Conv_2(h1).  Returns [N, out_dim]."""
    n, f = x.shape
    n_pad = _round_up(n, tile)
    x_pad = jnp.zeros((n_pad, f), jnp.float32).at[:n, :].set(
        x.astype(jnp.float32))
    adj_pad = jnp.zeros((n_pad, n_pad), jnp.int8).at[:n, :n].set(
        adj.astype(jnp.int8))
    ni = n_pad // tile
    # Per-(target tile, source tile) edge counts -> SMEM scalar prefetch.
    tile_nnz = adj_pad.astype(jnp.int32).reshape(ni, tile, ni, tile).sum(
        axis=(1, 3))

    h1 = gatv2_layer(x_pad, adj_pad, tile_nnz, params["conv1"],
                     apply_elu=True, tile=tile)
    # h1 is channel-padded to a multiple of 128 (zeros in the pad lanes) and
    # conv2's weights are zero-padded on their input dim to match, so h1
    # feeds straight into the second layer with no reshaping.
    h2 = gatv2_layer(h1, adj_pad, tile_nnz, params["conv2"],
                     apply_elu=False, tile=tile)
    return h2[:n, :out_dim]


def init_params(key, n_dim, n_latent, heads=1):
    assert heads == 1  # TODO(synk): multi-head not implemented (default is 1).
    d1 = 2 * n_latent            # conv1 out channels (concat=True, heads=1)
    d2 = n_latent                # conv2 out channels (concat=False)
    d1_pad = _round_up(d1, _LANE)
    d2_pad = _round_up(d2, _LANE)
    ks = jax.random.split(key, 6)

    def glorot_padded(k, shape, pad_shape):
        fan_in, fan_out = shape
        lim = (6.0 / (fan_in + fan_out)) ** 0.5
        w = jax.random.uniform(k, shape, jnp.float32, -lim, lim)
        return jnp.zeros(pad_shape, jnp.float32).at[:shape[0], :shape[1]].set(w)

    def layer(kw_l, kw_r, kw_a, f_in, f_in_pad, d, d_pad):
        return {
            "wl": glorot_padded(kw_l, (f_in, d), (f_in_pad, d_pad)),
            "wr": glorot_padded(kw_r, (f_in, d), (f_in_pad, d_pad)),
            "bl": jnp.zeros((1, d_pad), jnp.float32),   # lin_l bias (init 0)
            "br": jnp.zeros((1, d_pad), jnp.float32),   # lin_r bias (init 0)
            "att": glorot_padded(kw_a, (1, d), (1, d_pad)),
            "bias": jnp.zeros((1, d_pad), jnp.float32),
        }

    return {
        "conv1": layer(ks[0], ks[1], ks[2], n_dim, n_dim, d1, d1_pad),
        "conv2": layer(ks[3], ks[4], ks[5], d1, d1_pad, d2, d2_pad),
    }


def dense_adj_with_self_loops(edge_index, num_nodes):
    """adj[i, j] = 1 iff edge j -> i exists; diagonal forced to 1 (self loops)."""
    src, dst = edge_index[0], edge_index[1]
    adj = jnp.zeros((num_nodes, num_nodes), jnp.int8)
    adj = adj.at[dst, src].set(1)
    idx = jnp.arange(num_nodes)
    adj = adj.at[idx, idx].set(1)
    return adj


if __name__ == "__main__":
    key = jax.random.PRNGKey(0)
    k_x, k_p = jax.random.split(key)

    # Small graph: N=16 nodes, n_dim=8 input features, n_latent=4.
    N, n_dim, n_latent = 16, 8, 4
    x = jax.random.normal(k_x, (N, n_dim), jnp.float32)

    # Deterministic bidirectional ring graph: i <-> (i+1) mod N  (E = 32 edges).
    src = jnp.concatenate([jnp.arange(N), (jnp.arange(N) + 1) % N])
    dst = jnp.concatenate([(jnp.arange(N) + 1) % N, jnp.arange(N)])
    edge_index = jnp.stack([src, dst]).astype(jnp.int32)   # [2, 32]

    adj = dense_adj_with_self_loops(edge_index, N)
    params = init_params(k_p, n_dim, n_latent, heads=1)

    out = gat_encoder_forward(params, x, adj, out_dim=n_latent)
    out = jax.block_until_ready(out)

    assert out.shape == (N, n_latent), out.shape
    assert bool(jnp.all(jnp.isfinite(out)))
    print("KERNEL_OK")
</pallas_src>

<mosaic_0001>
module attributes {stable_mosaic.version = 11 : i64} {
  func.func @_proj_kernel(%arg0: i32, %arg1: memref<128x8xf32, #tpu.memory_space<vmem>>, %arg2: memref<8x128xf32, #tpu.memory_space<vmem>>, %arg3: memref<8x128xf32, #tpu.memory_space<vmem>>, %arg4: memref<1x128xf32, #tpu.memory_space<vmem>>, %arg5: memref<1x128xf32, #tpu.memory_space<vmem>>, %arg6: memref<128x128xf32, #tpu.memory_space<vmem>>, %arg7: memref<128x128xf32, #tpu.memory_space<vmem>>) attributes {dimension_semantics = [#tpu.dimension_semantics<parallel>], iteration_bounds = array<i64: 1>, scalar_prefetch = 0 : i64, scratch_operands = 0 : i64, tpu.core_type = #tpu.core_type<tc>, window_params = [{transform_indices = @transform_0, window_bounds = array<i64: 128, 8>}, {pipeline_mode = #tpu.pipeline_mode<synchronous>, transform_indices = @transform_1, window_bounds = array<i64: 8, 128>}, {pipeline_mode = #tpu.pipeline_mode<synchronous>, transform_indices = @transform_2, window_bounds = array<i64: 8, 128>}, {pipeline_mode = #tpu.pipeline_mode<synchronous>, transform_indices = @transform_3, window_bounds = array<i64: 1, 128>}, {pipeline_mode = #tpu.pipeline_mode<synchronous>, transform_indices = @transform_4, window_bounds = array<i64: 1, 128>}, {transform_indices = @transform_5, window_bounds = array<i64: 128, 128>}, {transform_indices = @transform_6, window_bounds = array<i64: 128, 128>}]} {
    %c0 = arith.constant 0 : index
    %c0_0 = arith.constant 0 : index
    %0 = vector.load %arg1[%c0, %c0_0] : memref<128x8xf32, #tpu.memory_space<vmem>>, vector<128x8xf32>
    %1 = arith.truncf %0 : vector<128x8xf32> to vector<128x8xbf16>
    %c0_1 = arith.constant 0 : index
    %c0_2 = arith.constant 0 : index
    %2 = vector.load %arg2[%c0_1, %c0_2] : memref<8x128xf32, #tpu.memory_space<vmem>>, vector<8x128xf32>
    %3 = arith.truncf %2 : vector<8x128xf32> to vector<8x128xbf16>
    %cst = arith.constant dense<0.000000e+00> : vector<128x128xf32>
    %4 = tpu.matmul %1, %3, %cst {dimension_numbers = #tpu.dot_dimension_numbers<[1], [0], [0], [1], [0, 0, 1, 1], [], []>} : vector<128x8xbf16>, vector<8x128xbf16>, vector<128x128xf32> -> vector<128x128xf32>
    %c0_3 = arith.constant 0 : index
    %c0_4 = arith.constant 0 : index
    %5 = vector.load %arg4[%c0_3, %c0_4] : memref<1x128xf32, #tpu.memory_space<vmem>>, vector<1x128xf32>
    %6 = vector.broadcast %5 : vector<1x128xf32> to vector<128x128xf32>
    %7 = arith.addf %4, %6 : vector<128x128xf32>
    %c0_5 = arith.constant 0 : index
    %c0_6 = arith.constant 0 : index
    %8 = vector.load %arg6[%c0_5, %c0_6] : memref<128x128xf32, #tpu.memory_space<vmem>>, vector<128x128xf32>
    tpu.vector_store %arg6[%c0_5, %c0_6], %7 {strides = array<i32>} : memref<128x128xf32, #tpu.memory_space<vmem>>, vector<128x128xf32>,
    %c0_7 = arith.constant 0 : index
    %c0_8 = arith.constant 0 : index
    %9 = vector.load %arg3[%c0_7, %c0_8] : memref<8x128xf32, #tpu.memory_space<vmem>>, vector<8x128xf32>
    %10 = arith.truncf %9 : vector<8x128xf32> to vector<8x128xbf16>
    %cst_9 = arith.constant dense<0.000000e+00> : vector<128x128xf32>
    %11 = tpu.matmul %1, %10, %cst_9 {dimension_numbers = #tpu.dot_dimension_numbers<[1], [0], [0], [1], [0, 0, 1, 1], [], []>} : vector<128x8xbf16>, vector<8x128xbf16>, vector<128x128xf32> -> vector<128x128xf32>
    %c0_10 = arith.constant 0 : index
    %c0_11 = arith.constant 0 : index
    %12 = vector.load %arg5[%c0_10, %c0_11] : memref<1x128xf32, #tpu.memory_space<vmem>>, vector<1x128xf32>
    %13 = vector.broadcast %12 : vector<1x128xf32> to vector<128x128xf32>
    %14 = arith.addf %11, %13 : vector<128x128xf32>
    %c0_12 = arith.constant 0 : index
    %c0_13 = arith.constant 0 : index
    %15 = vector.load %arg7[%c0_12, %c0_13] : memref<128x128xf32, #tpu.memory_space<vmem>>, vector<128x128xf32>
    tpu.vector_store %arg7[%c0_12, %c0_13], %14 {strides = array<i32>} : memref<128x128xf32, #tpu.memory_space<vmem>>, vector<128x128xf32>,
    return
  }
  func.func @transform_0(%arg0: i32) -> (i32, i32) {
    %c0_i32 = arith.constant 0 : i32
    %c0_i32_0 = arith.constant 0 : i32
    return %arg0, %c0_i32 : i32, i32
  }
  func.func @transform_1(%arg0: i32) -> (i32, i32) {
    %c0_i32 = arith.constant 0 : i32
    %c0_i32_0 = arith.constant 0 : i32
    %c0_i32_1 = arith.constant 0 : i32
    return %c0_i32, %c0_i32_0 : i32, i32
  }
  func.func @transform_2(%arg0: i32) -> (i32, i32) {
    %c0_i32 = arith.constant 0 : i32
    %c0_i32_0 = arith.constant 0 : i32
    %c0_i32_1 = arith.constant 0 : i32
    return %c0_i32, %c0_i32_0 : i32, i32
  }
  func.func @transform_3(%arg0: i32) -> (i32, i32) {
    %c0_i32 = arith.constant 0 : i32
    %c0_i32_0 = arith.constant 0 : i32
    %c0_i32_1 = arith.constant 0 : i32
    return %c0_i32, %c0_i32_0 : i32, i32
  }
  func.func @transform_4(%arg0: i32) -> (i32, i32) {
    %c0_i32 = arith.constant 0 : i32
    %c0_i32_0 = arith.constant 0 : i32
    %c0_i32_1 = arith.constant 0 : i32
    return %c0_i32, %c0_i32_0 : i32, i32
  }
  func.func @transform_5(%arg0: i32) -> (i32, i32) {
    %c0_i32 = arith.constant 0 : i32
    %c0_i32_0 = arith.constant 0 : i32
    return %arg0, %c0_i32 : i32, i32
  }
  func.func @transform_6(%arg0: i32) -> (i32, i32) {
    %c0_i32 = arith.constant 0 : i32
    %c0_i32_0 = arith.constant 0 : i32
    return %arg0, %c0_i32 : i32, i32
  }
}

</mosaic_0001>

<bundles_post_ra>
// kernel: tpu_custom_call.1
= control target key start
LH: loop header
LB: loop body
LE: loop exit
PB: predicated region body
PF: predicated region fallthrough
CT: control target
= control target key end

     0   :  { %12 = vsyncpa [#allocation3], 0  ;;  %vm80_vm0 = vcmask 1043456   ;;  %vm55_vm1 = vcmask 64512   ;;  %s492_s0 = inlined_call_operand.vmem [shape: f32[128,8], index: 0, kind: input, shape index: {}]   ;;  %s493_s1 = inlined_call_operand.vmem [shape: f32[8,128], index: 1, kind: input, shape index: {}]   ;;  %s494_s2 = inlined_call_operand.vmem [shape: f32[8,128], index: 2, kind: input, shape index: {}]   ;;  %s495_s3 = inlined_call_operand.vmem [shape: f32[1,128], index: 3, kind: input, shape index: {}]   ;;  %s496_s4 = inlined_call_operand.vmem [shape: f32[1,128], index: 4, kind: input, shape index: {}]   ;;  %s497_s5 = inlined_call_operand.hbm [shape: f32[128,128], index: 5, kind: output, shape index: {0}]   ;;  %s498_s6 = inlined_call_operand.hbm [shape: f32[128,128], index: 6, kind: output, shape index: {1}]  }
   0x1   :  { %v49_v0 = vld [vmem:[%s493_s1] sm:$0xff]  ;;  %v26_v5 = vld [vmem:[%s492_s0 + $0x8] sm:$0xff] }
   0x2   :  { %v149_v1 = vld [vmem:[%s494_s2] sm:$0xff]  ;;  %v50_v3 = vpack.c.bf16 %v49_v0, %v49_v0  ;;  %v34_v7 = vld [vmem:[%s492_s0 + $0x48] sm:$0xff] }
   0x3   :  { %v25_v2 = vld [vmem:[%s492_s0] sm:$0xff]  ;;  %v150_v4 = vpack.c.bf16 %v149_v1, %v149_v1 }
   0x4   :  { %v33_v6 = vld [vmem:[%s492_s0 + $0x40] sm:$0xff]  ;;  %v82_v8 = vsel %vm80_vm0, %v50_v3, 0  ;;  %v41_v10 = vpack.c.bf16 %v26_v5, %v25_v2 }
   0x5   :  { %v156_v9 = vsel %vm80_vm0, %v150_v4, 0  ;;  %v45_v11 = vpack.c.bf16 %v34_v7, %v33_v6  ;;  %91 = vmatpush.bf16.msra.mxu0 %v82_v8  ;;  %275 = vmatpush.bf16.msra.mxu2 %v82_v8 }
   0x6   :  { %13 = vsyncpa [#allocation5], 0  ;;  %165 = vmatpush.bf16.msra.mxu1 %v156_v9  ;;  %276 = vmatpush.bf16.msra.mxu3 %v156_v9  ;;  %v27_v12 = vld [vmem:[%s492_s0 + $0x10] sm:$0xff]  ;;  %v28_v13 = vld [vmem:[%s492_s0 + $0x18] sm:$0xff]  ;;  %s229_s10 = sshll.u32 %s497_s5, 4  ;;  %s336_s11 = smov [#allocation4]   ;;  %s230_s10 = int_to_ptr.hbm [resolvable:$true] %s229_s10 }
   0x7   :  { %v35_v14 = vld [vmem:[%s492_s0 + $0x50] sm:$0xff]  ;;  %v36_v15 = vld [vmem:[%s492_s0 + $0x58] sm:$0xff]  ;;  %v42_v16 = vpack.c.bf16 %v28_v13, %v27_v12  ;;  %v29_v18 = vld [vmem:[%s492_s0 + $0x20] sm:$0xff]  ;;  %s240_s12 = sshll.u32 %s336_s11, 4  ;;  %s242_s15 = sshll.u32 %s498_s6, 4  ;;  %s241_s12 = int_to_ptr.vmem [resolvable:$true] %s240_s12  ;;  %s243_s15 = int_to_ptr.hbm [resolvable:$true] %s242_s15 }
   0x8   :  { %259 = vmatmul.msk.bf16.vlgmr.msra.gmra.mxu0 %vm55_vm1, %v41_v10  ;;  %263 = vmatmul.msk.bf16.vlgmr.msra.gmra.mxu2 %vm55_vm1, %v45_v11  ;;  %v46_v17 = vpack.c.bf16 %v36_v15, %v35_v14  ;;  %v30_v19 = vld [vmem:[%s492_s0 + $0x28] sm:$0xff]  ;;  %v37_v20 = vld [vmem:[%s492_s0 + $0x60] sm:$0xff]  ;;  %v31_v24 = vld [vmem:[%s492_s0 + $0x30] sm:$0xff]  ;;  %s337_s5 = smov 128   ;;  %s338_s16 = smov 8  }
   0x9   :  { %267 = vmatmul.msk.bf16.vlgmr.msra.gmra.mxu1 %vm55_vm1, %v41_v10  ;;  %271 = vmatmul.msk.bf16.vlgmr.msra.gmra.mxu3 %vm55_vm1, %v45_v11  ;;  %v38_v21 = vld [vmem:[%s492_s0 + $0x68] sm:$0xff]  ;;  %v43_v22 = vpack.c.bf16 %v30_v19, %v29_v18  ;;  %v32_v25 = vld [vmem:[%s492_s0 + $0x38] sm:$0xff]  ;;  %v39_v26 = vld [vmem:[%s492_s0 + $0x70] sm:$0xff] }
   0xa   :  { %v47_v23 = vpack.c.bf16 %v38_v21, %v37_v20  ;;  %v40_v27 = vld [vmem:[%s492_s0 + $0x78] sm:$0xff]  ;;  %v44_v28 = vpack.c.bf16 %v32_v25, %v31_v24  ;;  %v447_v30 = vld [vmem:[%s495_s3] ss:$0 sm:$0xff]  ;;  %s335_s0 = smov [#allocation2]  }
   0xb   :  { %v48_v29 = vpack.c.bf16 %v40_v27, %v39_v26  ;;  %v452_v31 = vld [vmem:[%s496_s4] ss:$0 sm:$0xff]  ;;  %s227_s3 = sshll.u32 %s335_s0, 4  ;;  %s228_s3 = int_to_ptr.vmem [resolvable:$true] %s227_s3 }
  0x18   :  { %260 = vmatmul.msk.bf16.gmra.mxu0 %vm55_vm1, %v42_v16  ;;  %264 = vmatmul.msk.bf16.gmra.mxu2 %vm55_vm1, %v46_v17 }
  0x19   :  { %268 = vmatmul.msk.bf16.gmra.mxu1 %vm55_vm1, %v42_v16  ;;  %272 = vmatmul.msk.bf16.gmra.mxu3 %vm55_vm1, %v46_v17 }
  0x28   :  { %261 = vmatmul.msk.bf16.gmra.mxu0 %vm55_vm1, %v43_v22  ;;  %265 = vmatmul.msk.bf16.gmra.mxu2 %vm55_vm1, %v47_v23 }
  0x29   :  { %269 = vmatmul.msk.bf16.gmra.mxu1 %vm55_vm1, %v43_v22  ;;  %273 = vmatmul.msk.bf16.gmra.mxu3 %vm55_vm1, %v47_v23 }
  0x38   :  { %262 = vmatmul.msk.bf16.gmra.mxu0 %vm55_vm1, %v44_v28  ;;  %266 = vmatmul.msk.bf16.gmra.mxu2 %vm55_vm1, %v48_v29 }
  0x39   :  { %270 = vmatmul.msk.bf16.gmra.mxu1 %vm55_vm1, %v44_v28  ;;  %274 = vmatmul.msk.bf16.gmra.mxu3 %vm55_vm1, %v48_v29 }
  0x85   :  { %v93_v32 = vpop.f32.mrf.mxu0 }
  0x86   :  { %v94_v33 = vadd.f32 %v447_v30, %v93_v32  ;;  %v167_v34 = vpop.f32.mrf.mxu1 }
  0x87   :  { %v168_v35 = vadd.f32 %v452_v31, %v167_v34 }
  0x88   :  { %133 = vst [vmem:[#allocation2] sm:$0xff] %v94_v33 }
  0x89   :  { %207 = vst [vmem:[#allocation4] sm:$0xff] %v168_v35 }
  0x8b   :  { %v113_v36 = vpop.f32.mrf.mxu2 }
  0x8c   :  { %v114_v37 = vadd.f32 %v447_v30, %v113_v36  ;;  %v187_v38 = vpop.f32.mrf.mxu3 }
  0x8d   :  { %v188_v39 = vadd.f32 %v452_v31, %v187_v38  ;;  %v95_v40 = vpop.f32.mrf.mxu0 }
  0x8e   :  { %141 = vst [vmem:[#allocation2 + $0x40] sm:$0xff] %v114_v37  ;;  %v96_v41 = vadd.f32 %v447_v30, %v95_v40  ;;  %v169_v42 = vpop.f32.mrf.mxu1 }
  0x8f   :  { %215 = vst [vmem:[#allocation4 + $0x40] sm:$0xff] %v188_v39  ;;  %v170_v43 = vadd.f32 %v452_v31, %v169_v42 }
  0x90   :  { %134 = vst [vmem:[#allocation2 + $0x8] sm:$0xff] %v96_v41 }
  0x91   :  { %208 = vst [vmem:[#allocation4 + $0x8] sm:$0xff] %v170_v43 }
  0x93   :  { %v115_v44 = vpop.f32.mrf.mxu2 }
  0x94   :  { %v116_v45 = vadd.f32 %v447_v30, %v115_v44  ;;  %v189_v46 = vpop.f32.mrf.mxu3 }
  0x95   :  { %v190_v47 = vadd.f32 %v452_v31, %v189_v46  ;;  %v98_v48 = vpop.f32.mrf.mxu0 }
  0x96   :  { %142 = vst [vmem:[#allocation2 + $0x48] sm:$0xff] %v116_v45  ;;  %v99_v49 = vadd.f32 %v447_v30, %v98_v48  ;;  %v172_v50 = vpop.f32.mrf.mxu1 }
  0x97   :  { %216 = vst [vmem:[#allocation4 + $0x48] sm:$0xff] %v190_v47  ;;  %v173_v51 = vadd.f32 %v452_v31, %v172_v50 }
  0x98   :  { %135 = vst [vmem:[#allocation2 + $0x10] sm:$0xff] %v99_v49 }
  0x99   :  { %209 = vst [vmem:[#allocation4 + $0x10] sm:$0xff] %v173_v51 }
  0x9b   :  { %v118_v52 = vpop.f32.mrf.mxu2 }
  0x9c   :  { %v119_v53 = vadd.f32 %v447_v30, %v118_v52  ;;  %v192_v54 = vpop.f32.mrf.mxu3 }
  0x9d   :  { %v193_v55 = vadd.f32 %v452_v31, %v192_v54  ;;  %v100_v56 = vpop.f32.mrf.mxu0 }
  0x9e   :  { %143 = vst [vmem:[#allocation2 + $0x50] sm:$0xff] %v119_v53  ;;  %v101_v57 = vadd.f32 %v447_v30, %v100_v56  ;;  %v174_v58 = vpop.f32.mrf.mxu1 }
  0x9f   :  { %217 = vst [vmem:[#allocation4 + $0x50] sm:$0xff] %v193_v55  ;;  %v175_v59 = vadd.f32 %v452_v31, %v174_v58 }
  0xa0   :  { %136 = vst [vmem:[#allocation2 + $0x18] sm:$0xff] %v101_v57 }
  0xa1   :  { %210 = vst [vmem:[#allocation4 + $0x18] sm:$0xff] %v175_v59 }
  0xa3   :  { %v120_v60 = vpop.f32.mrf.mxu2 }
  0xa4   :  { %v121_v61 = vadd.f32 %v447_v30, %v120_v60  ;;  %v194_v62 = vpop.f32.mrf.mxu3 }
  0xa5   :  { %v195_v63 = vadd.f32 %v452_v31, %v194_v62  ;;  %v103_v0 = vpop.f32.mrf.mxu0 }
  0xa6   :  { %144 = vst [vmem:[#allocation2 + $0x58] sm:$0xff] %v121_v61  ;;  %v104_v1 = vadd.f32 %v447_v30, %v103_v0  ;;  %v177_v2 = vpop.f32.mrf.mxu1 }
  0xa7   :  { %218 = vst [vmem:[#allocation4 + $0x58] sm:$0xff] %v195_v63  ;;  %v178_v3 = vadd.f32 %v452_v31, %v177_v2 }
  0xa8   :  { %137 = vst [vmem:[#allocation2 + $0x20] sm:$0xff] %v104_v1 }
  0xa9   :  { %211 = vst [vmem:[#allocation4 + $0x20] sm:$0xff] %v178_v3 }
  0xab   :  { %v123_v4 = vpop.f32.mrf.mxu2 }
  0xac   :  { %v124_v5 = vadd.f32 %v447_v30, %v123_v4  ;;  %v197_v6 = vpop.f32.mrf.mxu3 }
  0xad   :  { %v198_v7 = vadd.f32 %v452_v31, %v197_v6  ;;  %v105_v8 = vpop.f32.mrf.mxu0 }
  0xae   :  { %145 = vst [vmem:[#allocation2 + $0x60] sm:$0xff] %v124_v5  ;;  %v106_v9 = vadd.f32 %v447_v30, %v105_v8  ;;  %v179_v10 = vpop.f32.mrf.mxu1 }
  0xaf   :  { %219 = vst [vmem:[#allocation4 + $0x60] sm:$0xff] %v198_v7  ;;  %v180_v11 = vadd.f32 %v452_v31, %v179_v10 }
  0xb0   :  { %138 = vst [vmem:[#allocation2 + $0x28] sm:$0xff] %v106_v9 }
  0xb1   :  { %212 = vst [vmem:[#allocation4 + $0x28] sm:$0xff] %v180_v11 }
  0xb3   :  { %v125_v12 = vpop.f32.mrf.mxu2 }
  0xb4   :  { %v126_v13 = vadd.f32 %v447_v30, %v125_v12  ;;  %v199_v14 = vpop.f32.mrf.mxu3 }
  0xb5   :  { %v200_v15 = vadd.f32 %v452_v31, %v199_v14  ;;  %v108_v16 = vpop.f32.mrf.mxu0 }
  0xb6   :  { %146 = vst [vmem:[#allocation2 + $0x68] sm:$0xff] %v126_v13  ;;  %v109_v17 = vadd.f32 %v447_v30, %v108_v16  ;;  %v182_v18 = vpop.f32.mrf.mxu1 }
  0xb7   :  { %220 = vst [vmem:[#allocation4 + $0x68] sm:$0xff] %v200_v15  ;;  %v183_v19 = vadd.f32 %v452_v31, %v182_v18 }
  0xb8   :  { %139 = vst [vmem:[#allocation2 + $0x30] sm:$0xff] %v109_v17 }
  0xb9   :  { %213 = vst [vmem:[#allocation4 + $0x30] sm:$0xff] %v183_v19 }
  0xbb   :  { %v128_v20 = vpop.f32.mrf.mxu2 }
  0xbc   :  { %v129_v21 = vadd.f32 %v447_v30, %v128_v20  ;;  %v202_v22 = vpop.f32.mrf.mxu3 }
  0xbd   :  { %v203_v23 = vadd.f32 %v452_v31, %v202_v22  ;;  %v110_v24 = vpop.f32.mrf.mxu0 }
  0xbe   :  { %147 = vst [vmem:[#allocation2 + $0x70] sm:$0xff] %v129_v21  ;;  %v111_v25 = vadd.f32 %v447_v30, %v110_v24  ;;  %v184_v26 = vpop.f32.mrf.mxu1 }
  0xbf   :  { %221 = vst [vmem:[#allocation4 + $0x70] sm:$0xff] %v203_v23  ;;  %v185_v27 = vadd.f32 %v452_v31, %v184_v26 }
  0xc0   :  { %140 = vst [vmem:[#allocation2 + $0x38] sm:$0xff] %v111_v25 }
  0xc1   :  { %214 = vst [vmem:[#allocation4 + $0x38] sm:$0xff] %v185_v27 }
  0xc3   :  { %v130_v28 = vpop.f32.mrf.mxu2 }
  0xc4   :  { %v131_v29 = vadd.f32 %v447_v30, %v130_v28  ;;  %v204_v32 = vpop.f32.mrf.mxu3 }
  0xc5   :  { %v205_v33 = vadd.f32 %v452_v31, %v204_v32 }
  0xc6   :  { %148 = vst [vmem:[#allocation2 + $0x78] sm:$0xff] %v131_v29 }
  0xc7   :  { %222 = vst [vmem:[#allocation4 + $0x78] sm:$0xff] %v205_v33  ;;  %235 = dma.vmem_to_hbm [thread:$0]  %s228_s3, 2048, %s230_s10, [#allocation3], %s337_s5, %s337_s5, %s338_s16  }
  0xc8   :  { %248 = dma.vmem_to_hbm [thread:$0]  %s241_s12, 2048, %s243_s15, [#allocation5], %s337_s5, %s337_s5, %s338_s16  }
  0xc9   :  { %331 = dma.done.wait [#allocation3], 2048  }
  0xca   :  { %332 = vsyncadd [#allocation3], 4294965248 }
  0xcb   :  { %333 = dma.done.wait [#allocation5], 2048  }
  0xcc   :  { %334 = vsyncadd [#allocation5], 4294965248 }
  0xcd   :  { %257 = vsyncpa [#allocation3], 1 }
  0xce   :  { %258 = vsyncpa [#allocation5], 1 }

</bundles_post_ra>
